<compile_context>
chip_gen: v7x
topology: tpu7x:2x2x1
jax: 0.10.0
libtpu: 0.0.40
codegen_flags: <defaults>
</compile_context>

<pallas_src>
import jax
import jax.numpy as jnp
from jax.experimental import pallas as pl
from jax.experimental.pallas import tpu as pltpu


def fused_linear_kernel(x_ref, w_ref, b_ref, o_ref):
    # Single fused affine map: out = x @ W_fused + b_fused (MXU, f32 accum).
    o_ref[...] = (
        jnp.dot(x_ref[...], w_ref[...], preferred_element_type=jnp.float32)
        + b_ref[...]
    ).astype(o_ref.dtype)


def _round_up(a, m):
    return (a + m - 1) // m * m


def prepack_params(w1, b1, w2, b2):
    """One-time prepack: fuse the two affine layers (no nonlinearity between).

    w1: [IN, HID], b1: [1, HID], w2: [HID, OUT], b2: [1, OUT]
    (weights stored transposed, [in, out], so the kernel does x @ W)
    Returns (w_fused [IN, OUT], b_fused [1, OUT]).
    """
    w_fused = jnp.dot(w1, w2, preferred_element_type=jnp.float32)
    b_fused = jnp.dot(b1, w2, preferred_element_type=jnp.float32) + b2
    return w_fused.astype(w1.dtype), b_fused.astype(b2.dtype)


def mlp_forward(x, w_fused, b_fused, *, tb=2048):
    """x: [B, IN]; w_fused: [IN, OUT]; b_fused: [1, OUT] -> [B, OUT]."""
    B, IN = x.shape
    OUT = w_fused.shape[1]

    # Batch tile selection:
    #  - small B: single block covering the whole batch (block dim == array dim
    #    is always legal, so no padding needed even for B=2),
    #  - mid-size B: split into 2 tiles so the "parallel" axis can shard across
    #    both v7x TensorCores,
    #  - large B: stream tb-row tiles (double-buffered x/out DMAs).
    tb_eff = _round_up(tb, 8)
    if B > tb_eff:
        TB = tb_eff
    elif B >= 1024:
        TB = _round_up(pl.cdiv(B, 2), 8)
    else:
        TB = B
    grid = (pl.cdiv(B, TB),)

    return pl.pallas_call(
        fused_linear_kernel,
        out_shape=jax.ShapeDtypeStruct((B, OUT), x.dtype),
        grid_spec=pl.GridSpec(
            grid=grid,
            in_specs=[
                # x tile streams over the batch grid (double-buffered).
                pl.BlockSpec((TB, IN), lambda i: (i, 0)),
                # Fused weight / bias: same block every step -> VMEM resident.
                pl.BlockSpec((IN, OUT), lambda i: (0, 0)),
                pl.BlockSpec((1, OUT), lambda i: (0, 0)),
            ],
            out_specs=pl.BlockSpec((TB, OUT), lambda i: (i, 0)),
        ),
        compiler_params=pltpu.CompilerParams(
            dimension_semantics=("parallel",)),
    )(x, w_fused, b_fused)


def init_params(key):
    # Deterministic synthetic init mirroring nn.Linear shapes:
    #   layers:        Linear(100, 100) -> W1 [100,100], b1 [1,100]
    #   linearlayers:  Linear(100, 64)  -> W2 [100,64],  b2 [1,64]
    k1, k2, k3, k4 = jax.random.split(key, 4)
    bound1 = 1.0 / jnp.sqrt(100.0)
    bound2 = 1.0 / jnp.sqrt(100.0)
    w1 = jax.random.uniform(k1, (100, 100), jnp.float32, -bound1, bound1)
    b1 = jax.random.uniform(k2, (1, 100), jnp.float32, -bound1, bound1)
    w2 = jax.random.uniform(k3, (100, 64), jnp.float32, -bound2, bound2)
    b2 = jax.random.uniform(k4, (1, 64), jnp.float32, -bound2, bound2)
    return w1, b1, w2, b2


if __name__ == "__main__":
    key = jax.random.PRNGKey(0)
    kx, kp = jax.random.split(key)
    x = jax.random.normal(kx, (2, 100), jnp.float32)
    w1, b1, w2, b2 = init_params(kp)

    # One-time prepack (outside the hot path).
    w_fused, b_fused = prepack_params(w1, b1, w2, b2)

    out = mlp_forward(x, w_fused, b_fused)
    out = jax.block_until_ready(out)

    # Pure-JAX reference of the ORIGINAL two-layer forward.
    ref = (x @ w1 + b1) @ w2 + b2
    assert out.shape == (2, 64)
    assert jnp.allclose(out, ref, atol=1e-4, rtol=1e-4)
    print("KERNEL_OK")
</pallas_src>

<mosaic_0001>
module attributes {stable_mosaic.version = 11 : i64} {
  func.func @fused_linear_kernel(%arg0: i32, %arg1: memref<2x100xf32, #tpu.memory_space<vmem>>, %arg2: memref<100x64xf32, #tpu.memory_space<vmem>>, %arg3: memref<1x64xf32, #tpu.memory_space<vmem>>, %arg4: memref<2x64xf32, #tpu.memory_space<vmem>>) attributes {dimension_semantics = [#tpu.dimension_semantics<parallel>], iteration_bounds = array<i64: 1>, scalar_prefetch = 0 : i64, scratch_operands = 0 : i64, tpu.core_type = #tpu.core_type<tc>, window_params = [{transform_indices = @transform_0, window_bounds = array<i64: 2, 100>}, {pipeline_mode = #tpu.pipeline_mode<synchronous>, transform_indices = @transform_1, window_bounds = array<i64: 100, 64>}, {pipeline_mode = #tpu.pipeline_mode<synchronous>, transform_indices = @transform_2, window_bounds = array<i64: 1, 64>}, {transform_indices = @transform_3, window_bounds = array<i64: 2, 64>}]} {
    %c0 = arith.constant 0 : index
    %c0_0 = arith.constant 0 : index
    %0 = vector.load %arg1[%c0, %c0_0] : memref<2x100xf32, #tpu.memory_space<vmem>>, vector<2x100xf32>
    %c0_1 = arith.constant 0 : index
    %c0_2 = arith.constant 0 : index
    %1 = vector.load %arg2[%c0_1, %c0_2] : memref<100x64xf32, #tpu.memory_space<vmem>>, vector<100x64xf32>
    %cst = arith.constant dense<0.000000e+00> : vector<2x64xf32>
    %2 = tpu.matmul %0, %1, %cst {dimension_numbers = #tpu.dot_dimension_numbers<[1], [0], [0], [1], [0, 0, 1, 1], [], []>} : vector<2x100xf32>, vector<100x64xf32>, vector<2x64xf32> -> vector<2x64xf32>
    %c0_3 = arith.constant 0 : index
    %c0_4 = arith.constant 0 : index
    %3 = vector.load %arg3[%c0_3, %c0_4] : memref<1x64xf32, #tpu.memory_space<vmem>>, vector<1x64xf32>
    %4 = vector.broadcast %3 : vector<1x64xf32> to vector<2x64xf32>
    %5 = arith.addf %2, %4 : vector<2x64xf32>
    %c0_5 = arith.constant 0 : index
    %c0_6 = arith.constant 0 : index
    %6 = vector.load %arg4[%c0_5, %c0_6] : memref<2x64xf32, #tpu.memory_space<vmem>>, vector<2x64xf32>
    tpu.vector_store %arg4[%c0_5, %c0_6], %5 {strides = array<i32>} : memref<2x64xf32, #tpu.memory_space<vmem>>, vector<2x64xf32>,
    return
  }
  func.func @transform_0(%arg0: i32) -> (i32, i32) {
    %c0_i32 = arith.constant 0 : i32
    %c0_i32_0 = arith.constant 0 : i32
    return %arg0, %c0_i32 : i32, i32
  }
  func.func @transform_1(%arg0: i32) -> (i32, i32) {
    %c0_i32 = arith.constant 0 : i32
    %c0_i32_0 = arith.constant 0 : i32
    %c0_i32_1 = arith.constant 0 : i32
    return %c0_i32, %c0_i32_0 : i32, i32
  }
  func.func @transform_2(%arg0: i32) -> (i32, i32) {
    %c0_i32 = arith.constant 0 : i32
    %c0_i32_0 = arith.constant 0 : i32
    %c0_i32_1 = arith.constant 0 : i32
    return %c0_i32, %c0_i32_0 : i32, i32
  }
  func.func @transform_3(%arg0: i32) -> (i32, i32) {
    %c0_i32 = arith.constant 0 : i32
    %c0_i32_0 = arith.constant 0 : i32
    return %arg0, %c0_i32 : i32, i32
  }
}

</mosaic_0001>

<bundles_post_ra>
// kernel: tpu_custom_call.1
= control target key start
LH: loop header
LB: loop body
LE: loop exit
PB: predicated region body
PF: predicated region fallthrough
CT: control target
= control target key end

     0   :  { %v222_v3 = vmov 0.0|0.0   ;;  %vm223_vm0 = vmmov 0   ;;  %v224_v6 = vmov 0.0   ;;  %s303_s0 = inlined_call_operand.vmem [shape: f32[2,100], index: 0, kind: input, shape index: {}]   ;;  %s304_s1 = inlined_call_operand.vmem [shape: f32[100,64], index: 1, kind: input, shape index: {}]   ;;  %s305_s2 = inlined_call_operand.vmem [shape: f32[1,64], index: 2, kind: input, shape index: {}]   ;;  %s306_s3 = inlined_call_operand.hbm [shape: f32[2,64], index: 3, kind: output, shape index: {}]  }
   0x1   :  { %v16_v0 = vld [vmem:[%s304_s1] sm:$0xff]  ;;  %v17_v1 = vld [vmem:[%s304_s1 + $0x8] sm:$0xff]  ;;  %v18_v2 = vld [vmem:[%s304_s1 + $0x10] sm:$0xff]  ;;  %176 = vmatprep.subr.bf16.mxu0 %v222_v3  ;;  %173 = vmatprep.mubr.msk.f32.mxu0 %vm223_vm0, %v224_v6 }
   0x2   :  { %v177_v4 = vpack.c.bf16 %v17_v1, %v16_v0  ;;  %v19_v5 = vld [vmem:[%s304_s1 + $0x18] sm:$0xff]  ;;  %v20_v8 = vld [vmem:[%s304_s1 + $0x20] sm:$0xff]  ;;  %v21_v9 = vld [vmem:[%s304_s1 + $0x28] sm:$0xff] }
   0x3   :  { %v180_v7 = vpack.c.bf16 %v19_v5, %v18_v2 }
   0x4   :  { %178 = vmatpush3.bf16.msra.mxu0 %v177_v4 }
   0x5   :  { %179 = vmatprep.subr.bf16.mxu0 %v222_v3 }
   0x6   :  { %8 = vsyncpa [#allocation3], 0  ;;  %v183_v10 = vpack.c.bf16 %v21_v9, %v20_v8  ;;  %v22_v11 = vld [vmem:[%s304_s1 + $0x30] sm:$0xff]  ;;  %v23_v12 = vld [vmem:[%s304_s1 + $0x38] sm:$0xff]  ;;  %vm40_vm1 = vcmask 1043456   ;;  %vm36_vm2 = vcmask 818176  }
   0x7   :  { %v186_v13 = vpack.c.bf16 %v23_v12, %v22_v11  ;;  %v24_v14 = vld [vmem:[%s304_s1 + $0x40] sm:$0xff]  ;;  %v25_v15 = vld [vmem:[%s304_s1 + $0x48] sm:$0xff]  ;;  %v26_v17 = vld [vmem:[%s304_s1 + $0x50] sm:$0xff]  ;;  %s225_s15 = smov [#allocation2]   ;;  %vm114_vm3 = vcmask 517120  }
   0x8   :  { %181 = vmatpush3.bf16.msra.mxu0 %v180_v7  ;;  %v189_v16 = vpack.c.bf16 %v25_v15, %v24_v14  ;;  %v27_v18 = vld [vmem:[%s304_s1 + $0x58] sm:$0xff]  ;;  %v28_v20 = vld [vmem:[%s304_s1 + $0x60] sm:$0xf]  ;;  %s122_s16 = sshll.u32 %s225_s15, 4  ;;  %s123_s16 = int_to_ptr.vmem [resolvable:$true] %s122_s16 }
   0x9   :  { %182 = vmatprep.subr.bf16.mxu0 %v222_v3  ;;  %v192_v19 = vpack.c.bf16 %v27_v18, %v26_v17  ;;  %v15_v21 = vld [vmem:[%s303_s0] sm:$0x3]  ;;  %s198_s1 = scalar_lea.vmem %s123_s16, 32  ;;  %p203_p1 = scmp.lt.s32.totalorder %s123_s16, %s123_s16 }
   0xa   :  { %v130_v22 = vld [vmem:[%s305_s2] ss:$0 sm:$0xff]  ;;  %p199_p0 = scmp.ne.s32.totalorder %s123_s16, %s198_s1  ;;  %p204_p2 = scmp.lt.s32.totalorder %s198_s1, %s198_s1 }
   0xc   :  { %184 = vmatpush3.bf16.msra.mxu0 %v183_v10  ;;  %p205_p3 = por %p204_p2, %p203_p1 }
   0xd   :  { %185 = vmatprep.subr.bf16.mxu0 %v222_v3 }
   0xe   :  { %p206_p4 = pnand %p205_p3, %p199_p0 }
  0x10   :  { %187 = vmatpush3.bf16.msra.mxu0 %v186_v13 }
  0x11   :  { %188 = vmatprep.subr.bf16.mxu0 %v222_v3 }
  0x14   :  { %190 = vmatpush3.bf16.msra.mxu0 %v189_v16 }
  0x15   :  { %191 = vmatprep.subr.bf16.mxu0 %v222_v3 }
  0x18   :  { %193 = vmatpush3.bf16.msra.mxu0 %v192_v19 }
  0x19   :  { %171 = vmatprep.subr.mxu0 %v224_v6 }
  0x1c   :  { %172 = vmatpush3.msk.msra.mxu0 %vm40_vm1, %v28_v20 }
  0x1d   :  { %174 = vmatmul.mubr.msk.f32.vlgmr.msra.gmra.mrb[0].mxu0 %vm36_vm2, %v15_v21 }
  0xf0   :  { %v110_v23 = vpop.f32.mrb[0].mxu0 }
  0xf1   :  { %v111_v24 = vadd.f32 %v130_v22, %v110_v23  ;;  %v175_v25 = vpop.f32.mrb[1].mxu0 }
  0xf3   :  { %115 = vst.msk [vmem:[#allocation2] sm:$0x3] %vm114_vm3, %v111_v24 }
  0xf4   :  { %209 = shalt.err (!%p206_p4)
}
  0xf5   :  { %s210_s18 = scalar_lea.hbm %s306_s3, 32 }
  0xf6   :  { %p211_p5 = scmp.ne.s32.totalorder %s306_s3, %s210_s18  ;;  %p214_p6 = scmp.lt.u32.totalorder %s210_s18, %s306_s3 }
  0xf8   :  { %p216_p7 = pnand %p214_p6, %p211_p5 }
  0xfa   :  { %219 = shalt.err (!%p216_p7)
}
  0xfb   :  { %125 = dma.vmem_to_hbm [thread:$0]  %s123_s16, 32, %s306_s3, [#allocation3]  }
  0xfc   :  { %220 = dma.done.wait [#allocation3], 32  }
  0xfd   :  { %221 = vsyncadd [#allocation3], 4294967264 }
  0xfe   :  { %129 = vsyncpa [#allocation3], 1 }

</bundles_post_ra>
